<compile_context>
chip_gen: v6e
topology: v6e:2x2x1
jax: 0.10.0
libtpu: 0.0.40
codegen_flags: <defaults>
</compile_context>

<pallas_src>
import functools

import jax
import jax.numpy as jnp
from jax.experimental import pallas as pl
from jax.experimental.pallas import tpu as pltpu


def _outconv1x1_kernel(x_ref, w_ref, b_ref, o_ref, *, clamp01):
    # x_ref: (C_in, T)   w_ref: (C_out, C_in)   b_ref: (C_out, 1)
    # o_ref: (C_out, T)  -- T is the spatial (lane) tile, multiple of 128.
    y = jnp.dot(w_ref[...], x_ref[...], preferred_element_type=jnp.float32)
    y = y + b_ref[...]                      # free VPU filler
    if clamp01:
        y = jnp.clip(y, 0.0, 1.0)           # fused clamp from ModelCombination
    o_ref[...] = y.astype(o_ref.dtype)


def out_conv_clamp(x_nchw, weight, bias, *, clamp01=True, t_hw=None):
    """1x1 Conv2d (+ optional clamp to [0,1]) forward.

    x_nchw : (N, C_in, H, W)
    weight : (C_out, C_in, 1, 1)   -- PyTorch Conv2d weight layout
    bias   : (C_out,)
    returns: (N, C_out, H, W)
    """
    N, C_in, H, W = x_nchw.shape
    C_out = weight.shape[0]
    HW = H * W

    # Layout plumbing only — contiguous reshapes, no transposes / HBM copies.
    x_nck = x_nchw.reshape(N, C_in, HW)
    w_oc = weight.reshape(C_out, C_in)
    b_col = bias.reshape(C_out, 1)

    # Spatial tile: lane-dense (multiple of 128); ~2048 columns keeps the
    # double-buffered per-block VMEM footprint small (< ~0.5 MiB in f32) on
    # every generation, including v7x's smaller VMEM.
    if t_hw is None:
        t_hw = min(HW, 2048) if HW % 128 == 0 else HW  # full-extent fallback
    grid = (N, pl.cdiv(HW, t_hw))   # edge tiles are masked on store

    kernel = functools.partial(_outconv1x1_kernel, clamp01=clamp01)

    y = pl.pallas_call(
        kernel,
        out_shape=jax.ShapeDtypeStruct((N, C_out, HW), x_nchw.dtype),
        grid=grid,
        in_specs=[
            # batch dim squeezed out of the kernel view
            pl.BlockSpec((None, C_in, t_hw), lambda n, j: (n, 0, j)),
            # weight / bias stay resident (same block every step -> no re-DMA)
            pl.BlockSpec((C_out, C_in), lambda n, j: (0, 0)),
            pl.BlockSpec((C_out, 1), lambda n, j: (0, 0)),
        ],
        out_specs=pl.BlockSpec((None, C_out, t_hw), lambda n, j: (n, 0, j)),
        compiler_params=pltpu.CompilerParams(
            # both axes independent -> megacore sharding on v7x
            dimension_semantics=("parallel", "parallel"),
        ),
    )(x_nck, w_oc, b_col)

    return y.reshape(N, C_out, H, W)


def _reference(x, weight, bias, clamp01=True):
    C_out, C_in = weight.shape[0], weight.shape[1]
    y = (
        jnp.einsum("nchw,oc->nohw", x, weight.reshape(C_out, C_in))
        + bias[None, :, None, None]
    )
    return jnp.clip(y, 0.0, 1.0) if clamp01 else y


if __name__ == "__main__":
    # Shapes consistent with the module: UNet(first_channels=32, n_classes=3)
    # -> OutConv has in_channels=32, out_channels=3.  Small spatial sizes.
    key = jax.random.PRNGKey(0)
    kx, kw, kb = jax.random.split(key, 3)

    C_in, C_out = 32, 3
    weight = jax.random.normal(kw, (C_out, C_in, 1, 1), dtype=jnp.float32) * 0.1
    bias = jax.random.normal(kb, (C_out,), dtype=jnp.float32) * 0.1

    # (N, H, W) cases: single tile, multi-tile grid, and non-multiple-of-128 HW.
    cases = [(2, 16, 16), (2, 64, 64), (2, 24, 24)]
    for idx, (N, H, W) in enumerate(cases):
        x = jax.random.normal(
            jax.random.fold_in(kx, idx), (N, C_in, H, W), dtype=jnp.float32
        )
        y = out_conv_clamp(x, weight, bias, clamp01=True)
        jax.block_until_ready(y)

        y_ref = _reference(x, weight, bias, clamp01=True)
        assert y.shape == (N, C_out, H, W)
        assert jnp.allclose(y, y_ref, atol=1e-5, rtol=1e-5)

    print("KERNEL_OK")
</pallas_src>

<mosaic_0001>
module attributes {stable_mosaic.version = 11 : i64} {
  func.func @_outconv1x1_kernel(%arg0: i32, %arg1: i32, %arg2: memref<1x32x256xf32, #tpu.memory_space<vmem>>, %arg3: memref<3x32xf32, #tpu.memory_space<vmem>>, %arg4: memref<3x1xf32, #tpu.memory_space<vmem>>, %arg5: memref<1x3x256xf32, #tpu.memory_space<vmem>>) attributes {dimension_semantics = [#tpu.dimension_semantics<parallel>, #tpu.dimension_semantics<parallel>], iteration_bounds = array<i64: 2, 1>, scalar_prefetch = 0 : i64, scratch_operands = 0 : i64, tpu.core_type = #tpu.core_type<tc>, window_params = [{transform_indices = @transform_0, window_bounds = array<i64: 1, 32, 256>}, {pipeline_mode = #tpu.pipeline_mode<synchronous>, transform_indices = @transform_1, window_bounds = array<i64: 3, 32>}, {pipeline_mode = #tpu.pipeline_mode<synchronous>, transform_indices = @transform_2, window_bounds = array<i64: 3, 1>}, {transform_indices = @transform_3, window_bounds = array<i64: 1, 3, 256>}]} {
    %c0 = arith.constant 0 : index
    %c0_0 = arith.constant 0 : index
    %0 = vector.load %arg3[%c0, %c0_0] : memref<3x32xf32, #tpu.memory_space<vmem>>, vector<3x32xf32>
    %c0_1 = arith.constant 0 : index
    %c0_2 = arith.constant 0 : index
    %c0_3 = arith.constant 0 : index
    %1 = vector.load %arg2[%c0_1, %c0_2, %c0_3] : memref<1x32x256xf32, #tpu.memory_space<vmem>>, vector<1x32x256xf32>
    %2 = vector.shape_cast %1 : vector<1x32x256xf32> to vector<32x256xf32>
    %cst = arith.constant dense<0.000000e+00> : vector<3x256xf32>
    %3 = tpu.matmul %0, %2, %cst {dimension_numbers = #tpu.dot_dimension_numbers<[1], [0], [0], [1], [0, 0, 1, 1], [], []>} : vector<3x32xf32>, vector<32x256xf32>, vector<3x256xf32> -> vector<3x256xf32>
    %c0_4 = arith.constant 0 : index
    %c0_5 = arith.constant 0 : index
    %4 = vector.load %arg4[%c0_4, %c0_5] : memref<3x1xf32, #tpu.memory_space<vmem>>, vector<3x1xf32>
    %5 = vector.broadcast %4 : vector<3x1xf32> to vector<3x256xf32>
    %6 = arith.addf %3, %5 : vector<3x256xf32>
    %cst_6 = arith.constant 0.000000e+00 : f32
    %cst_7 = arith.constant 1.000000e+00 : f32
    %7 = vector.broadcast %cst_6 : f32 to vector<3x256xf32>
    %8 = arith.maximumf %7, %6 : vector<3x256xf32>
    %9 = vector.broadcast %cst_7 : f32 to vector<3x256xf32>
    %10 = arith.minimumf %9, %8 : vector<3x256xf32>
    %c0_8 = arith.constant 0 : index
    %c0_9 = arith.constant 0 : index
    %c0_10 = arith.constant 0 : index
    %11 = vector.load %arg5[%c0_8, %c0_9, %c0_10] : memref<1x3x256xf32, #tpu.memory_space<vmem>>, vector<1x3x256xf32>
    %12 = vector.shape_cast %11 : vector<1x3x256xf32> to vector<3x256xf32>
    %13 = vector.shape_cast %10 : vector<3x256xf32> to vector<1x3x256xf32>
    tpu.vector_store %arg5[%c0_8, %c0_9, %c0_10], %13 {strides = array<i32>} : memref<1x3x256xf32, #tpu.memory_space<vmem>>, vector<1x3x256xf32>,
    return
  }
  func.func @transform_0(%arg0: i32, %arg1: i32) -> (i32, i32, i32) {
    %c0_i32 = arith.constant 0 : i32
    %c0_i32_0 = arith.constant 0 : i32
    return %arg0, %c0_i32, %arg1 : i32, i32, i32
  }
  func.func @transform_1(%arg0: i32, %arg1: i32) -> (i32, i32) {
    %c0_i32 = arith.constant 0 : i32
    %c0_i32_0 = arith.constant 0 : i32
    %c0_i32_1 = arith.constant 0 : i32
    return %c0_i32, %c0_i32_0 : i32, i32
  }
  func.func @transform_2(%arg0: i32, %arg1: i32) -> (i32, i32) {
    %c0_i32 = arith.constant 0 : i32
    %c0_i32_0 = arith.constant 0 : i32
    %c0_i32_1 = arith.constant 0 : i32
    return %c0_i32, %c0_i32_0 : i32, i32
  }
  func.func @transform_3(%arg0: i32, %arg1: i32) -> (i32, i32, i32) {
    %c0_i32 = arith.constant 0 : i32
    %c0_i32_0 = arith.constant 0 : i32
    return %arg0, %c0_i32, %arg1 : i32, i32, i32
  }
}

</mosaic_0001>

<bundles_post_ra>
// kernel: tpu_custom_call.1
= control target key start
LH: loop header
LB: loop body
LE: loop exit
PB: predicated region body
PF: predicated region fallthrough
CT: control target
= control target key end

     0   :  { %8 = vsyncpa [#allocation3], 0  ;;  %s696_s0 = inlined_call_operand.hbm [shape: f32[2,32,256], index: 0, kind: input, shape index: {}]   ;;  %s697_s1 = inlined_call_operand.vmem [shape: f32[3,32], index: 1, kind: input, shape index: {}]   ;;  %s698_s2 = inlined_call_operand.vmem [shape: f32[3,1], index: 2, kind: input, shape index: {}]   ;;  %s699_s3 = inlined_call_operand.vmem [shape: f32[2,3,256], index: 3, kind: output, shape index: {}]  }
   0x1   :  { %10 = vsyncpa [#allocation3 + $0x1], 0  ;;  %s594_s12 = smov 0   ;;  %s596_s13 = smov 0  }
   0x2   :  { %s598_s14 = smov 0   ;;  %s600_s15 = smov 0  }
   0x3   :  { %s602_s16 = smov 0   ;;  %s604_s17 = smov 0  }
   0x4 LB: > { %s413_s18 = sadd.s32 4294967295, %s567_s17   ;;  %s28_s19 = sadd.s32 1, %s563_s16  ;;  %s567_s17 = sphi %s604_s17, %s16_s17   ;;  %s563_s16 = sphi %s602_s16, %s707_s16   ;;  %s559_s15 = sphi %s600_s15, %s706_s15   ;;  %s555_s14 = sphi %s598_s14, %s705_s14   ;;  %s551_s13 = sphi %s596_s13, %s704_s13   ;;  %s547_s12 = sphi %s594_s12, %s703_s12  }
   0x5   : > { %p30_p0 = scmp.ge.s32.totalorder %s28_s19, 2  ;;  %s37_s20 = sadd.s32 1, %s555_s14 }
   0x6   : > { %p44_p1 = scmp.ne.s32.totalorder %s555_s14, %s551_s13  ;;  %p45_p2 = scmp.eq.s32.totalorder %s567_s17, 0 }
   0x7   : > { %s709_s19 = smov (%p30_p0, %s28_s19), 0  ;;  %p50_p4 = scmp.ne.s32.totalorder %s551_s13, %s547_s12 }
   0x8   : > { %p630_p3 = por %p45_p2, %p44_p1  ;;  %s32_s22 = ssub.s32 %s563_s16, %s709_s19 }
   0x9   : > { %p51_p5 = scmp.eq.s32.totalorder %s413_s18, 0  ;;  %p35_p6 = scmp.eq.s32.totalorder %s32_s22, 0 }
   0xa   : > { %p435_p8 = scmp.lt.s32.totalorder %s567_s17, 2  ;;  %s150_s25 = sand.u32 1, %s555_s14  }
   0xb   : > { %p637_p7 = por %p51_p5, %p50_p4  ;;  %s427_s26 = sshll.u32 %s563_s16, 10 }
   0xc   : > { %s643_s24 = scalar_select %p35_p6, %s555_s14, %s37_s20  }
   0xd   : > { %s417_s27 = sshll.u32 %s150_s25, 6  ;;  %s162_s30 = scalar_lea.hbm %s696_s0, %s427_s26 }
   0xe   : > { %s154_s4 = scalar_lea.vmem [#allocation2], %s417_s27  ;;  %p652_p9 = pnand %p435_p8, %p630_p3 }
   0xf   : > { %s163_s5 = sshll.u32 %s154_s4, 4  ;;  %s151_s7 = scalar_lea.sflag [#allocation3], %s150_s25  ;;  %s164_s5 = int_to_ptr.vmem [resolvable:$true] %s163_s5 }
  0x10   : > { %p491_p10 = pneg %p652_p9  ;;  %s502_s8 = scalar_lea.vmem %s164_s5, 1024 }
  0x11   : > { %p503_p11 = scmp.ne.s32.totalorder %s164_s5, %s502_s8  ;;  %s569_s9 = smov [#allocation2]  }
  0x12   : > { %s507_s10 = sshll.u32 %s569_s9, 4  ;;  %s508_s10 = int_to_ptr.vmem [resolvable:$false] %s507_s10 }
  0x13   : > { %p505_p12 = pnand %p503_p11, %p491_p10  ;;  %s509_s11 = scalar_lea.vmem %s508_s10, 2048 }
  0x14   : > { %p510_p0 = scmp.lt.s32.totalorder %s164_s5, %s508_s10  ;;  %p511_p1 = scmp.lt.s32.totalorder %s509_s11, %s502_s8 }
  0x15   : > { %p506_p13 = pneg %p505_p12 }
  0x16   : > { %p512_p2 = por %p511_p1, %p510_p0 }
  0x18   : > { %p513_p3 = pnand %p512_p2, %p506_p13 }
  0x1a   : > { %516 = shalt.err (!%p513_p3)
}
  0x1b   : > { %s570_s12 = smov 256   ;;  %s571_s18 = smov 16  }
  0x1c   : > { %434 = dma.hbm_to_vmem [thread:$0]  (!%p652_p9), %s162_s30, 1024, %s164_s5, %s151_s7, %s570_s12, %s570_s12, %s571_s18  }
  0x1d   : > { %p420_p4 = scmp.ge.s32.totalorder %s567_s17, 1  ;;  %p171_p5 = scmp.lt.s32.totalorder %s567_s17, 3 }
  0x1f   : > { %p172_p6 = pnand %p420_p4, %p171_p5 }
  0x20   : > { %s177_s20 = sand.u32 (!%p172_p6), 1, %s551_s13  }
  0x21   : > { %175 = sbr.rel (%p172_p6) target bundleno = 253 (0xfd), region = 32  ;;  %s421_s21 = sshll.u32 (!%p172_p6), %s177_s20, 6 }
  0x22   : > { %s178_s22 = scalar_lea.sflag (!%p172_p6), [#allocation3], %s177_s20  ;;  %s181_s25 = scalar_lea.vmem (!%p172_p6), [#allocation2], %s421_s21 }
  0x26   : > { %542 = dma.done.wait (%p637_p7), %s178_s22, 1024  }
  0x27   : > { %544 = vsyncadd (%p637_p7), %s178_s22, 4294966272  ;;  %v572_v0 = vmov 0.0   ;;  %v573_v1 = vmov 0   ;;  %v227_v2 = vld [vmem:[%s181_s25 + $0x38] sm:$0xff]  ;;  %v226_v3 = vld [vmem:[%s181_s25 + $0x30] sm:$0xff]  ;;  %vm234_vm0 = vcmask 261120  }
  0x28   : > { %302 = vmatprep.mubr.f32.mxu0 %v572_v0  ;;  %488 = vset.pattern.permute.xlu0 %v573_v1  ;;  %v225_v4 = vld [vmem:[%s181_s25 + $0x28] sm:$0xff]  ;;  %v224_v5 = vld [vmem:[%s181_s25 + $0x20] sm:$0xff]  ;;  %v223_v6 = vld [vmem:[%s181_s25 + $0x18] sm:$0xff]  ;;  %p210_p7 = scmp.lt.s32.totalorder %s559_s15, 1 }
  0x29   : > { %262 = vmatprep.subr.mxu0 %v227_v2  ;;  %v222_v7 = vld [vmem:[%s181_s25 + $0x10] sm:$0xff]  ;;  %v228_v8 = vld [vmem:[%s698_s2] sm:$0x7]  ;;  %v221_v9 = vld [vmem:[%s181_s25 + $0x8] sm:$0xff] }
  0x2a   : > { %263 = vmatpush1.msra.mxu0 %v226_v3  ;;  %231 = vperm.xlu0 %488, %v228_v8   ;;  %v220_v10 = vld [vmem:[%s181_s25] sm:$0xff]  ;;  %s711_s15 = smov (!%p210_p7, %s559_s15), 1 }
  0x2b   : > { %264 = vmatprep.subr.mxu0 %v225_v4  ;;  %v219_v11 = vld [vmem:[%s697_s1] sm:$0x7]  ;;  %s428_s29 = sshll.u32 %s711_s15, 3 }
  0x2c   : > { %265 = vmatpush1.msra.mxu0 %v224_v5  ;;  %s217_s5 = scalar_lea.vmem %s699_s3, %s428_s29 }
  0x2d   : > { %266 = vmatprep.subr.mxu0 %v223_v6 }
  0x2e   : > { %267 = vmatpush1.msra.mxu0 %v222_v7 }
  0x2f   : > { %268 = vmatprep.subr.mxu0 %v221_v9 }
  0x30   : > { %269 = vmatpush1.msra.mxu0 %v220_v10 }
  0x31   : > { %424 = vmatmul.mubr.msk.f32.vlgmr.msra.gmra.mxu0 %vm234_vm0, %v219_v11 }
  0xa5   : > { %v232_v12 = vpop.permute.xlu0 %231 }
  0xf1   : > { %v304_v13 = vpop.f32.mrf.mxu0 }
  0xf2   : > { %v305_v14 = vadd.f32 %v304_v13, %v232_v12 }
  0xf3   : > { %v306_v15 = vpop.f32.mrf.mxu0 }
  0xf4   : > { %v309_v16 = vmax.f32 %v305_v14, 0.0  ;;  %v307_v17 = vadd.f32 %v306_v15, %v232_v12 }
  0xf6   : > { %v310_v18 = vmax.f32 %v307_v17, 0.0  ;;  %v311_v19 = vmin.f32 %v309_v16, 1.0 }
  0xf8   : > { %v312_v20 = vmin.f32 %v310_v18, 1.0 }
  0xfa   : > { %v315_v21 = vcombine.low %v311_v19, %v312_v20 }
  0xfc   : > { %317 = vst [vmem:[%s217_s5] sm:$0x77] %v315_v21 }
  0xfd PF: > { %s16_s17 = sadd.s32 1, %s567_s17   ;;  %s703_s12 = smov %s551_s13 }
  0xfe   : > { %p13_p8 = scmp.ge.s32.totalorder %s16_s17, 4   ;;  %s704_s13 = smov %s555_s14 }
  0xff   : > { %s705_s14 = smov %s643_s24  ;;  %s706_s15 = smov %s563_s16 }
 0x100   : > { %s707_s16 = smov %s709_s19  ;;  %15 = sbr.rel (!%p13_p8) target bundleno = 4 (0x4), region = 72 }
 0x105   :  { %348 = vsyncpa [#allocation3], 1 }
 0x106   :  { %350 = vsyncpa [#allocation3 + $0x1], 1 }

</bundles_post_ra>
